<compile_context>
chip_gen: v6e
topology: v6e:2x2x1
jax: 0.10.0
libtpu: 0.0.40
codegen_flags: <defaults>
</compile_context>

<pallas_src>
import jax
import jax.numpy as jnp
from jax.experimental import pallas as pl
from jax.experimental.pallas import tpu as pltpu

LANE = 128          # vreg lane width
SUBLANE_BF16 = 16   # bf16 sublane packing (rows per packed vreg)
TM_MAX = 1024       # max batch tile (multiple of 256 for MXU M, of 16 for bf16)


def _round_up(n, m):
    return ((n + m - 1) // m) * m


def _make_mlp_kernel(n_layers):
    """Fused N-layer MLP on one batch tile: h = relu(h @ W_i + b_i) for each i.

    Args to the returned kernel (in order): x_ref, w_0..w_{n-1}, bias_ref, o_ref.
    x / W are bf16 (MXU inputs); accumulation, bias-add and ReLU are f32.
    Intermediates stay in vregs/VMEM; no HBM traffic between layers.
    """

    def kernel(x_ref, *refs):
        w_refs = refs[:n_layers]
        bias_ref = refs[n_layers]
        o_ref = refs[n_layers + 1]
        cdt = w_refs[0].dtype  # bf16 compute dtype for the MXU

        h = x_ref[...]
        for i in range(n_layers):
            w = w_refs[i][...]
            width = w.shape[1]                       # static
            b = bias_ref[i:i + 1, :width]            # (1, width) f32, static slice
            acc = jnp.dot(h, w, preferred_element_type=jnp.float32)
            h = jnp.maximum(acc + b, 0.0)
            if i < n_layers - 1:
                h = h.astype(cdt)
        o_ref[...] = h.astype(o_ref.dtype)

    return kernel


def prepare_params(params, compute_dtype=jnp.bfloat16):
    """One-time prep: pad + cast weights to bf16, pack biases into one f32 tile.

    params: list of (W_t [in, out] f32, b [out] f32), layers in order.
    Intermediate layer OUT dims are padded to a multiple of 128 (zero rows/cols,
    so padded columns stay exactly 0 through ReLU); the FINAL layer out dim is
    left at its real width so the kernel writes only real output columns.
    """
    n = len(params)
    padded_ws = []
    bias_rows = []
    prev_in = params[0][0].shape[0]      # first-layer in dim: NOT padded
    for idx, (w_t, b) in enumerate(params):
        fin, fout = w_t.shape
        out_pad = fout if idx == n - 1 else _round_up(fout, LANE)
        wp = (jnp.zeros((prev_in, out_pad), compute_dtype)
              .at[:fin, :fout].set(w_t.astype(compute_dtype)))
        padded_ws.append(wp)
        bias_rows.append((jnp.asarray(b, jnp.float32).reshape(-1), out_pad))
        prev_in = out_pad

    max_w = max(op for _, op in bias_rows)
    bias_packed = jnp.zeros((_round_up(n, 8), max_w), jnp.float32)
    for i, (bv, _) in enumerate(bias_rows):
        bias_packed = bias_packed.at[i, :bv.shape[0]].set(bv)

    out_dim = params[-1][0].shape[1]
    return tuple(padded_ws), bias_packed, out_dim, compute_dtype


def full_connect_layer(x, prepared):
    """x: [B, in_dim] f32.  prepared: output of prepare_params (pre-padded bf16)."""
    ws, bias_packed, out_dim, compute_dtype = prepared
    B, in_dim = x.shape
    n = len(ws)

    # --- batch tiling: multiple of 16 (bf16 sublane packing); >=2 grid steps
    # for mid/large batches so both v7x TensorCores get work; single step for
    # tiny batches (pure-overhead regime). ---
    b_pad = _round_up(B, SUBLANE_BF16)
    if b_pad > 2 * SUBLANE_BF16:
        tm = min(TM_MAX, _round_up((b_pad + 1) // 2, SUBLANE_BF16))
    else:
        tm = b_pad
    b_pad = _round_up(B, tm)

    xp = x.astype(compute_dtype)
    if b_pad != B:
        xp = jnp.pad(xp, ((0, b_pad - B), (0, 0)))

    grid = (b_pad // tm,)

    # advisory cost estimate for XLA's scheduler
    flops = sum(2 * b_pad * w.shape[0] * w.shape[1] for w in ws)
    bytes_accessed = (int(xp.size) * 2
                      + sum(int(w.size) * 2 for w in ws)
                      + int(bias_packed.size) * 4
                      + b_pad * out_dim * 4)

    in_specs = [pl.BlockSpec((tm, in_dim), lambda i: (i, 0))]       # batch-tiled x
    for w in ws:                                                    # resident weights
        in_specs.append(pl.BlockSpec(w.shape, lambda i: (0, 0)))
    in_specs.append(pl.BlockSpec(bias_packed.shape, lambda i: (0, 0)))  # packed biases

    out_p = pl.pallas_call(
        _make_mlp_kernel(n),
        out_shape=jax.ShapeDtypeStruct((b_pad, out_dim), jnp.float32),
        grid=grid,
        in_specs=in_specs,
        out_specs=pl.BlockSpec((tm, out_dim), lambda i: (i, 0)),
        compiler_params=pltpu.CompilerParams(
            dimension_semantics=("parallel",),      # megacore sharding on v7x
            vmem_limit_bytes=32 * 1024 * 1024,      # safe against v7x's 64 MiB VMEM
        ),
        cost_estimate=pl.CostEstimate(
            flops=int(flops), transcendentals=0, bytes_accessed=int(bytes_accessed)),
    )(xp, *ws, bias_packed)

    # only batch padding (if any) needs slicing; padded batch rows are never consumed
    return out_p[:B] if b_pad != B else out_p


def init_params(key, layer_elems):
    """Deterministic init mimicking nn.Linear default (uniform(+-1/sqrt(fan_in)))."""
    params = []
    dims = list(layer_elems)
    pre = dims.pop(0)
    for out in dims:
        key, kw, kb = jax.random.split(key, 3)
        bound = 1.0 / jnp.sqrt(pre)
        w = jax.random.uniform(kw, (out, pre), jnp.float32, -bound, bound)  # [out, in]
        b = jax.random.uniform(kb, (out,), jnp.float32, -bound, bound)
        params.append((w.T, b))   # kernel consumes W_t [in, out], b [out]
        pre = out
    return params


def reference_forward(x, params, compute_dtype=jnp.bfloat16):
    """Pure-JAX reference matching the kernel's numerics (bf16 MXU inputs, f32 acc)."""
    h = x.astype(compute_dtype)
    n = len(params)
    for idx, (w_t, b) in enumerate(params):
        w = w_t.astype(compute_dtype)
        acc = jnp.dot(h.astype(jnp.float32), w.astype(jnp.float32)) + b.reshape(1, -1)
        h = jnp.maximum(acc, 0.0)
        if idx < n - 1:
            h = h.astype(compute_dtype)
    return h.astype(jnp.float32)


if __name__ == "__main__":
    key = jax.random.PRNGKey(0)
    k_x, k_p = jax.random.split(key)

    layer_elems = [32, 64, 48, 16]   # FullConnectLayer([32, 64, 48, 16])
    batch = 8
    x = jax.random.normal(k_x, (batch, layer_elems[0]), jnp.float32)

    params = init_params(k_p, list(layer_elems))
    prepared = prepare_params(params)            # one-time: pad + cast + pack biases

    out = full_connect_layer(x, prepared)
    out = jax.block_until_ready(out)

    ref = reference_forward(x, params)
    assert out.shape == (batch, layer_elems[-1])
    assert jnp.allclose(out, ref, atol=1e-3, rtol=1e-3), "mismatch vs reference"

    # TODO(synk): bnorm=True / dropout branches of __init__ are not exercised by
    # the default config and are not implemented in the kernel.
    print("KERNEL_OK")
</pallas_src>

<mosaic_0001>
module attributes {stable_mosaic.version = 11 : i64} {
  func.func @kernel(%arg0: i32, %arg1: memref<16x32xbf16, #tpu.memory_space<vmem>>, %arg2: memref<32x128xbf16, #tpu.memory_space<vmem>>, %arg3: memref<128x128xbf16, #tpu.memory_space<vmem>>, %arg4: memref<128x16xbf16, #tpu.memory_space<vmem>>, %arg5: memref<8x128xf32, #tpu.memory_space<vmem>>, %arg6: memref<16x16xf32, #tpu.memory_space<vmem>>) attributes {dimension_semantics = [#tpu.dimension_semantics<parallel>], iteration_bounds = array<i64: 1>, scalar_prefetch = 0 : i64, scratch_operands = 0 : i64, tpu.core_type = #tpu.core_type<tc>, window_params = [{transform_indices = @transform_0, window_bounds = array<i64: 16, 32>}, {pipeline_mode = #tpu.pipeline_mode<synchronous>, transform_indices = @transform_1, window_bounds = array<i64: 32, 128>}, {pipeline_mode = #tpu.pipeline_mode<synchronous>, transform_indices = @transform_2, window_bounds = array<i64: 128, 128>}, {pipeline_mode = #tpu.pipeline_mode<synchronous>, transform_indices = @transform_3, window_bounds = array<i64: 128, 16>}, {pipeline_mode = #tpu.pipeline_mode<synchronous>, transform_indices = @transform_4, window_bounds = array<i64: 8, 128>}, {transform_indices = @transform_5, window_bounds = array<i64: 16, 16>}]} {
    %c0 = arith.constant 0 : index
    %c0_0 = arith.constant 0 : index
    %0 = vector.load %arg1[%c0, %c0_0] : memref<16x32xbf16, #tpu.memory_space<vmem>>, vector<16x32xbf16>
    %c0_1 = arith.constant 0 : index
    %c0_2 = arith.constant 0 : index
    %1 = vector.load %arg2[%c0_1, %c0_2] : memref<32x128xbf16, #tpu.memory_space<vmem>>, vector<32x128xbf16>
    %c0_3 = arith.constant 0 : index
    %c0_4 = arith.constant 0 : index
    %2 = vector.load %arg5[%c0_3, %c0_4] : memref<8x128xf32, #tpu.memory_space<vmem>>, vector<1x128xf32>
    %cst = arith.constant dense<0.000000e+00> : vector<16x128xf32>
    %3 = tpu.matmul %0, %1, %cst {dimension_numbers = #tpu.dot_dimension_numbers<[1], [0], [0], [1], [0, 0, 1, 1], [], []>} : vector<16x32xbf16>, vector<32x128xbf16>, vector<16x128xf32> -> vector<16x128xf32>
    %4 = vector.broadcast %2 : vector<1x128xf32> to vector<16x128xf32>
    %5 = arith.addf %3, %4 : vector<16x128xf32>
    %cst_5 = arith.constant 0.000000e+00 : f32
    %6 = vector.broadcast %cst_5 : f32 to vector<16x128xf32>
    %7 = arith.maximumf %5, %6 : vector<16x128xf32>
    %8 = arith.truncf %7 : vector<16x128xf32> to vector<16x128xbf16>
    %c0_6 = arith.constant 0 : index
    %c0_7 = arith.constant 0 : index
    %9 = vector.load %arg3[%c0_6, %c0_7] : memref<128x128xbf16, #tpu.memory_space<vmem>>, vector<128x128xbf16>
    %c1 = arith.constant 1 : index
    %c0_8 = arith.constant 0 : index
    %10 = vector.load %arg5[%c1, %c0_8] : memref<8x128xf32, #tpu.memory_space<vmem>>, vector<1x128xf32>
    %cst_9 = arith.constant dense<0.000000e+00> : vector<16x128xf32>
    %11 = tpu.matmul %8, %9, %cst_9 {dimension_numbers = #tpu.dot_dimension_numbers<[1], [0], [0], [1], [0, 0, 1, 1], [], []>} : vector<16x128xbf16>, vector<128x128xbf16>, vector<16x128xf32> -> vector<16x128xf32>
    %12 = vector.broadcast %10 : vector<1x128xf32> to vector<16x128xf32>
    %13 = arith.addf %11, %12 : vector<16x128xf32>
    %cst_10 = arith.constant 0.000000e+00 : f32
    %14 = vector.broadcast %cst_10 : f32 to vector<16x128xf32>
    %15 = arith.maximumf %13, %14 : vector<16x128xf32>
    %16 = arith.truncf %15 : vector<16x128xf32> to vector<16x128xbf16>
    %c0_11 = arith.constant 0 : index
    %c0_12 = arith.constant 0 : index
    %17 = vector.load %arg4[%c0_11, %c0_12] : memref<128x16xbf16, #tpu.memory_space<vmem>>, vector<128x16xbf16>
    %c2 = arith.constant 2 : index
    %c0_13 = arith.constant 0 : index
    %18 = vector.load %arg5[%c2, %c0_13] : memref<8x128xf32, #tpu.memory_space<vmem>>, vector<1x16xf32>
    %cst_14 = arith.constant dense<0.000000e+00> : vector<16x16xf32>
    %19 = tpu.matmul %16, %17, %cst_14 {dimension_numbers = #tpu.dot_dimension_numbers<[1], [0], [0], [1], [0, 0, 1, 1], [], []>} : vector<16x128xbf16>, vector<128x16xbf16>, vector<16x16xf32> -> vector<16x16xf32>
    %20 = vector.broadcast %18 : vector<1x16xf32> to vector<16x16xf32>
    %21 = arith.addf %19, %20 : vector<16x16xf32>
    %cst_15 = arith.constant 0.000000e+00 : f32
    %22 = vector.broadcast %cst_15 : f32 to vector<16x16xf32>
    %23 = arith.maximumf %21, %22 : vector<16x16xf32>
    %c0_16 = arith.constant 0 : index
    %c0_17 = arith.constant 0 : index
    %24 = vector.load %arg6[%c0_16, %c0_17] : memref<16x16xf32, #tpu.memory_space<vmem>>, vector<16x16xf32>
    tpu.vector_store %arg6[%c0_16, %c0_17], %23 {strides = array<i32>} : memref<16x16xf32, #tpu.memory_space<vmem>>, vector<16x16xf32>,
    return
  }
  func.func @transform_0(%arg0: i32) -> (i32, i32) {
    %c0_i32 = arith.constant 0 : i32
    %c0_i32_0 = arith.constant 0 : i32
    return %arg0, %c0_i32 : i32, i32
  }
  func.func @transform_1(%arg0: i32) -> (i32, i32) {
    %c0_i32 = arith.constant 0 : i32
    %c0_i32_0 = arith.constant 0 : i32
    %c0_i32_1 = arith.constant 0 : i32
    return %c0_i32, %c0_i32_0 : i32, i32
  }
  func.func @transform_2(%arg0: i32) -> (i32, i32) {
    %c0_i32 = arith.constant 0 : i32
    %c0_i32_0 = arith.constant 0 : i32
    %c0_i32_1 = arith.constant 0 : i32
    return %c0_i32, %c0_i32_0 : i32, i32
  }
  func.func @transform_3(%arg0: i32) -> (i32, i32) {
    %c0_i32 = arith.constant 0 : i32
    %c0_i32_0 = arith.constant 0 : i32
    %c0_i32_1 = arith.constant 0 : i32
    return %c0_i32, %c0_i32_0 : i32, i32
  }
  func.func @transform_4(%arg0: i32) -> (i32, i32) {
    %c0_i32 = arith.constant 0 : i32
    %c0_i32_0 = arith.constant 0 : i32
    %c0_i32_1 = arith.constant 0 : i32
    return %c0_i32, %c0_i32_0 : i32, i32
  }
  func.func @transform_5(%arg0: i32) -> (i32, i32) {
    %c0_i32 = arith.constant 0 : i32
    %c0_i32_0 = arith.constant 0 : i32
    return %arg0, %c0_i32 : i32, i32
  }
}

</mosaic_0001>

<bundles_post_ra>
// kernel: tpu_custom_call.1
= control target key start
LH: loop header
LB: loop body
LE: loop exit
PB: predicated region body
PF: predicated region fallthrough
CT: control target
= control target key end

     0   :  { %10 = vsyncpa [#allocation3], 0  ;;  %s679_s0 = inlined_call_operand.vmem [shape: bf16[16,32], index: 0, kind: input, shape index: {}]   ;;  %s680_s1 = inlined_call_operand.hbm [shape: bf16[32,128], index: 1, kind: input, shape index: {}]   ;;  %s681_s2 = inlined_call_operand.vmem [shape: bf16[128,128], index: 2, kind: input, shape index: {}]   ;;  %s682_s3 = inlined_call_operand.vmem [shape: bf16[128,16], index: 3, kind: input, shape index: {}]   ;;  %s683_s4 = inlined_call_operand.hbm [shape: f32[8,128], index: 4, kind: input, shape index: {}]   ;;  %s684_s5 = inlined_call_operand.hbm [shape: f32[16,16], index: 5, kind: output, shape index: {}]  }
   0x1   :  { %11 = vsyncpa [#allocation6], 0 }
   0x2   :  { %12 = vsyncpa [#allocation4], 0  ;;  %s556_s18 = smov [#allocation2]  }
   0x3   :  { %s20_s19 = sshll.u32 %s556_s18, 4  ;;  %s21_s19 = int_to_ptr.vmem [resolvable:$true] %s20_s19 }
   0x4   :  { %s498_s20 = scalar_lea.vmem %s21_s19, 256  ;;  %p503_p1 = scmp.lt.s32.totalorder %s21_s19, %s21_s19 }
   0x5   :  { %p499_p0 = scmp.ne.s32.totalorder %s21_s19, %s498_s20  ;;  %p504_p2 = scmp.lt.s32.totalorder %s498_s20, %s498_s20 }
   0x7   :  { %p505_p3 = por %p504_p2, %p503_p1 }
   0x9   :  { %p506_p4 = pnand %p505_p3, %p499_p0 }
   0xb   :  { %509 = shalt.err (!%p506_p4)
}
   0xc   :  { %s557_s21 = smov 64   ;;  %s558_s22 = smov 4  }
   0xd   :  { %26 = dma.hbm_to_vmem [thread:$0]  %s680_s1, 256, %s21_s19, [#allocation3], %s557_s21, %s557_s21, %s558_s22  }
   0xe   :  { %s559_s25 = smov [#allocation5]  }
   0xf   :  { %s37_s26 = sshll.u32 %s559_s25, 4  ;;  %s38_s26 = int_to_ptr.vmem [resolvable:$true] %s37_s26 }
  0x10   :  { %s518_s27 = scalar_lea.vmem %s38_s26, 128  ;;  %p523_p6 = scmp.lt.s32.totalorder %s38_s26, %s38_s26 }
  0x11   :  { %p519_p5 = scmp.ne.s32.totalorder %s38_s26, %s518_s27  ;;  %p524_p7 = scmp.lt.s32.totalorder %s518_s27, %s518_s27 }
  0x13   :  { %p525_p8 = por %p524_p7, %p523_p6 }
  0x15   :  { %p526_p9 = pnand %p525_p8, %p519_p5 }
  0x17   :  { %529 = shalt.err (!%p526_p9)
}
  0x18   :  { %40 = dma.hbm_to_vmem [thread:$0]  %s683_s4, 128, %s38_s26, [#allocation6]  }
  0x19   :  { %550 = dma.done.wait [#allocation3], 256  }
  0x1a   :  { %551 = vsyncadd [#allocation3], 4294967040 }
  0x1b   :  { %552 = dma.done.wait [#allocation6], 128  }
  0x1c   :  { %553 = vsyncadd [#allocation6], 4294967168  ;;  %v560_v0 = vmov 0.0   ;;  %vm561_vm0 = vmmov 0   ;;  %v471_v1 = vld [vmem:[#allocation2 + $0x8] sm:$0xff]   ;;  %v472_v2 = vld [vmem:[#allocation2] sm:$0xff]  }
  0x1d   :  { %414 = vmatprep.subr.bf16.mxu0 %v560_v0  ;;  %418 = vmatprep.mubr.msk.bf16.mxu0 %vm561_vm0, %v560_v0  ;;  %v474_v3 = vld [vmem:[%s681_s2 + $0x38] sm:$0xff]   ;;  %v473_v4 = vld [vmem:[%s679_s0] sm:$0xff]   ;;  %v475_v5 = vld [vmem:[%s681_s2 + $0x30] sm:$0xff]   ;;  %vm76_vm1 = vcmask 261120   ;;  %vm349_vm2 = vcmask 130048   ;;  %s562_s8 = smov [#allocation7]  }
  0x1e   :  { %422 = vmatprep.subr.bf16.mxu1 %v560_v0  ;;  %438 = vmatprep.mubr.msk.bf16.mxu1 %vm561_vm0, %v560_v0  ;;  %v476_v6 = vld [vmem:[%s681_s2 + $0x28] sm:$0xff]   ;;  %v477_v7 = vld [vmem:[%s681_s2 + $0x20] sm:$0xff]   ;;  %v478_v8 = vld [vmem:[%s681_s2 + $0x18] sm:$0xff]  }
  0x1f   :  { %415 = vmatpush3.bf16.msra.mxu0 %v471_v1  ;;  %423 = vmatpush3.bf16.msra.mxu1 %v474_v3  ;;  %v479_v9 = vld [vmem:[%s681_s2 + $0x10] sm:$0xff]   ;;  %v480_v10 = vld [vmem:[%s681_s2 + $0x8] sm:$0xff]   ;;  %v481_v11 = vld [vmem:[%s681_s2] sm:$0xff]  }
  0x20   :  { %416 = vmatprep.subr.bf16.mxu0 %v560_v0  ;;  %424 = vmatprep.subr.bf16.mxu1 %v560_v0  ;;  %v482_v12 = vld [vmem:[%s682_s3 + $0x38] sm:$0xff]   ;;  %v483_v13 = vld [vmem:[%s682_s3 + $0x30] sm:$0xff]   ;;  %v484_v14 = vld [vmem:[%s682_s3 + $0x28] sm:$0xff]  }
  0x21   :  { %v485_v15 = vld [vmem:[%s682_s3 + $0x20] sm:$0xff]   ;;  %v486_v16 = vld [vmem:[%s682_s3 + $0x18] sm:$0xff]   ;;  %v370_v17 = vld [vmem:[#allocation5] ss:$0 sm:$0xff] }
  0x22   :  { %v487_v27 = vld [vmem:[%s682_s3 + $0x10] sm:$0xff]   ;;  %v488_v28 = vld [vmem:[%s682_s3 + $0x8] sm:$0xff]   ;;  %v489_v29 = vld [vmem:[%s682_s3] sm:$0xff]   ;;  %s357_s3 = sshll.u32 %s562_s8, 4  ;;  %s358_s3 = int_to_ptr.vmem [resolvable:$true] %s357_s3 }
  0x23   :  { %417 = vmatpush3.bf16.msra.mxu0 %v472_v2  ;;  %425 = vmatpush3.bf16.msra.mxu1 %v475_v5  ;;  %v375_v30 = vld [vmem:[#allocation5 + $0x1] ss:$0 sm:$0xff]  ;;  %v384_v40 = vld [vmem:[#allocation5 + $0x2] ss:$0 sm:$0xff]  ;;  %s530_s9 = scalar_lea.vmem %s358_s3, 256  ;;  %p535_p11 = scmp.lt.s32.totalorder %s358_s3, %s358_s3 }
  0x24   :  { %442 = vmatprep.subr.bf16.mxu0 %v560_v0  ;;  %426 = vmatprep.subr.bf16.mxu1 %v560_v0  ;;  %p531_p10 = scmp.ne.s32.totalorder %s358_s3, %s530_s9  ;;  %p536_p12 = scmp.lt.s32.totalorder %s530_s9, %s530_s9 }
  0x26   :  { %419 = vmatmul.mubr.msk.bf16.vlgmr.msra.gmra.mxu0 %vm76_vm1, %v473_v4  ;;  %p537_p13 = por %p536_p12, %p535_p11 }
  0x27   :  { %458 = vmatprep.mubr.msk.bf16.mxu0 %vm561_vm0, %v560_v0  ;;  %427 = vmatpush3.bf16.msra.mxu1 %v476_v6 }
  0x28   :  { %428 = vmatprep.subr.bf16.mxu1 %v560_v0  ;;  %443 = vmatpush3.bf16.msra.mxu0 %v482_v12  ;;  %p538_p0 = pnand %p537_p13, %p531_p10 }
  0x29   :  { %444 = vmatprep.subr.bf16.mxu0 %v560_v0 }
  0x2b   :  { %429 = vmatpush3.bf16.msra.mxu1 %v477_v7 }
  0x2c   :  { %430 = vmatprep.subr.bf16.mxu1 %v560_v0  ;;  %445 = vmatpush3.bf16.msra.mxu0 %v483_v13 }
  0x2d   :  { %446 = vmatprep.subr.bf16.mxu0 %v560_v0 }
  0x2f   :  { %431 = vmatpush3.bf16.msra.mxu1 %v478_v8 }
  0x30   :  { %432 = vmatprep.subr.bf16.mxu1 %v560_v0  ;;  %447 = vmatpush3.bf16.msra.mxu0 %v484_v14 }
  0x31   :  { %448 = vmatprep.subr.bf16.mxu0 %v560_v0 }
  0x33   :  { %433 = vmatpush3.bf16.msra.mxu1 %v479_v9 }
  0x34   :  { %434 = vmatprep.subr.bf16.mxu1 %v560_v0  ;;  %449 = vmatpush3.bf16.msra.mxu0 %v485_v15 }
  0x35   :  { %450 = vmatprep.subr.bf16.mxu0 %v560_v0 }
  0x37   :  { %435 = vmatpush3.bf16.msra.mxu1 %v480_v10 }
  0x38   :  { %436 = vmatprep.subr.bf16.mxu1 %v560_v0  ;;  %451 = vmatpush3.bf16.msra.mxu0 %v486_v16 }
  0x39   :  { %452 = vmatprep.subr.bf16.mxu0 %v560_v0 }
  0x3b   :  { %437 = vmatpush3.bf16.msra.mxu1 %v481_v11 }
  0x3c   :  { %453 = vmatpush3.bf16.msra.mxu0 %v487_v27 }
  0x3d   :  { %454 = vmatprep.subr.bf16.mxu0 %v560_v0 }
  0x40   :  { %455 = vmatpush3.bf16.msra.mxu0 %v488_v28 }
  0x41   :  { %456 = vmatprep.subr.bf16.mxu0 %v560_v0 }
  0x44   :  { %457 = vmatpush3.bf16.msra.mxu0 %v489_v29 }
  0xe6   :  { %v114_v18 = vpop.f32.mrf.mxu0 }
  0xe7   :  { %v115_v20 = vadd.f32 %v370_v17, %v114_v18 }
  0xe8   :  { %v420_v19 = vpop.f32.mrf.mxu0 }
  0xe9   :  { %v121_v24 = vmax.f32 %v115_v20, 0.0 }
  0xea   :  { %v117_v21 = vpop.f32.mrf.mxu0 }
  0xeb   :  { %v118_v22 = vadd.f32 %v370_v17, %v117_v21 }
  0xec   :  { %v421_v23 = vpop.f32.mrf.mxu0 }
  0xed   :  { %v122_v25 = vmax.f32 %v118_v22, 0.0 }
  0xef   :  { %v123_v26 = vpack.c.bf16 %v122_v25, %v121_v24 }
  0xf1   :  { %439 = vmatmul.mubr.bf16.vlgmr.msra.gmra.mxu1 %v123_v26 }
 0x1b1   :  { %v227_v31 = vpop.f32.mrf.mxu1 }
 0x1b2   :  { %v228_v33 = vadd.f32 %v375_v30, %v227_v31 }
 0x1b3   :  { %v440_v32 = vpop.f32.mrf.mxu1 }
 0x1b4   :  { %v234_v37 = vmax.f32 %v228_v33, 0.0 }
 0x1b5   :  { %v230_v34 = vpop.f32.mrf.mxu1 }
 0x1b6   :  { %v231_v35 = vadd.f32 %v375_v30, %v230_v34 }
 0x1b7   :  { %v441_v36 = vpop.f32.mrf.mxu1 }
 0x1b8   :  { %v235_v38 = vmax.f32 %v231_v35, 0.0 }
 0x1ba   :  { %v236_v39 = vpack.c.bf16 %v235_v38, %v234_v37 }
 0x1bc   :  { %459 = vmatmul.mubr.bf16.vlgmr.msra.gmra.mxu0 %v236_v39 }
 0x27c   :  { %v340_v41 = vpop.f32.mrf.mxu0 }
 0x27d   :  { %v341_v42 = vadd.f32 %v384_v40, %v340_v41 }
 0x27e   :  { %v460_v43 = vpop.f32.mrf.mxu0 }
 0x27f   :  { %v347_v44 = vmax.f32 %v341_v42, 0.0 }
 0x280   :  { %v343_v45 = vpop.f32.mrf.mxu0 }
 0x281   :  { %350 = vst.msk [vmem:[#allocation7] sm:$0xff] %vm349_vm2, %v347_v44  ;;  %v344_v46 = vadd.f32 %v384_v40, %v343_v45 }
 0x282   :  { %v461_v47 = vpop.f32.mrf.mxu0 }
 0x283   :  { %v348_v48 = vmax.f32 %v344_v46, 0.0 }
 0x285   :  { %351 = vst.msk [vmem:[#allocation7 + $0x8] sm:$0xff] %vm349_vm2, %v348_v48 }
 0x286   :  { %541 = shalt.err (!%p538_p0)
}
 0x287   :  { %s563_s10 = smov 128   ;;  %s564_s0 = smov 8  }
 0x288   :  { %363 = dma.vmem_to_hbm [thread:$0]  %s358_s3, 256, %s684_s5, [#allocation4], %s563_s10, %s563_s10, %s564_s0  }
 0x289   :  { %554 = dma.done.wait [#allocation4], 256  }
 0x28a   :  { %555 = vsyncadd [#allocation4], 4294967040 }
 0x28b   :  { %367 = vsyncpa [#allocation3], 1 }
 0x28c   :  { %368 = vsyncpa [#allocation6], 1 }
 0x28d   :  { %369 = vsyncpa [#allocation4], 1 }

</bundles_post_ra>
